<compile_context>
chip_gen: v7x
topology: tpu7x:2x2x1
jax: 0.10.0
libtpu: 0.0.40
codegen_flags: <defaults>
</compile_context>

<pallas_src>
import math

import jax
import jax.numpy as jnp
from jax import lax
from jax.experimental import pallas as pl
from jax.experimental.pallas import tpu as pltpu

_INV_SQRT2 = 1.0 / math.sqrt(2.0)


def _round_up(a, b):
    return (a + b - 1) // b * b


def _pick_row_tile(M, tm):
    """Clamp tm to the (padded) row count; split into 2 tiles for v7x megacore."""
    tm = min(tm, _round_up(M, 8))
    # If one tile would cover every row but M is big enough to split, use two
    # row tiles so both of v7x's TensorCores get work on the "parallel" i axis.
    if tm >= M and M >= 512:
        tm = _round_up((M + 1) // 2, 8)
    return tm


def mlm_head_kernel(x_ref, wd_ref, bd_ref, g_ref, beta_ref, emb_ref, db_ref,
                    o_ref, h_ref):
    # x_ref:    (tm, H)  input rows (compute dtype, e.g. bf16)
    # wd_ref:   (H, H)   dense weight, pre-transposed to (in, out)
    # bd_ref:   (1, H)   dense bias (f32)
    # g_ref:    (1, H)   LayerNorm gamma (f32)
    # beta_ref: (1, H)   LayerNorm beta (f32)
    # emb_ref:  (H, tn)  decoder weight tile, pre-transposed (streams over V)
    # db_ref:   (1, tn)  decoder bias tile (f32)
    # o_ref:    (tm, tn) output logits tile (out_dtype, bf16 by default)
    # h_ref:    (tm, H)  VMEM scratch: normalized hidden state, reused over V

    @pl.when(pl.program_id(1) == 0)
    def _():
        # dense: (tm, H) @ (H, H), MXU, f32 accumulation
        h = jnp.dot(x_ref[...], wd_ref[...], preferred_element_type=jnp.float32)
        h = h + bd_ref[...].astype(jnp.float32)
        # exact-erf GELU: x * 0.5 * (1 + erf(x / sqrt(2)))   (f32 elementwise)
        h = h * 0.5 * (1.0 + lax.erf(h * jnp.float32(_INV_SQRT2)))
        # LayerNorm over last dim, eps=1e-12, biased variance (torch semantics)
        mu = jnp.mean(h, axis=-1, keepdims=True)
        var = jnp.mean(jnp.square(h - mu), axis=-1, keepdims=True)
        h = (h - mu) * lax.rsqrt(var + jnp.float32(1e-12))
        h = h * g_ref[...].astype(jnp.float32) + beta_ref[...].astype(jnp.float32)
        h_ref[...] = h.astype(h_ref.dtype)

    # decoder: (tm, H) @ (H, tn), MXU, f32 accumulation, + bias tile
    logits = jnp.dot(h_ref[...], emb_ref[...], preferred_element_type=jnp.float32)
    logits = logits + db_ref[...].astype(jnp.float32)
    o_ref[...] = logits.astype(o_ref.dtype)


def prepare_mlm_head_params(params, *, tn=2048, compute_dtype=jnp.bfloat16):
    """One-time weight prep: transpose to lane-dense (K, N), cast, pad vocab.

    Call once at model init and reuse the result across calls so the per-call
    hot path never pays the (V, H) transpose/cast/pad.
    """
    H = params["dense_w"].shape[0]           # nn.Linear(H, H) weight is [out, in]
    V = params["emb"].shape[0]               # tied embedding [V, H]

    tn = min(tn, _round_up(V, 128))          # (., 128)-aligned vocab tile
    assert tn % 128 == 0
    Vp = _round_up(V, tn)

    wd_t = params["dense_w"].T.astype(compute_dtype)   # (H, H)  [in, out]
    emb_t = params["emb"].T.astype(compute_dtype)      # (H, V)
    dec_b = params["dec_b"].astype(jnp.float32)
    if Vp != V:
        emb_t = jnp.pad(emb_t, ((0, 0), (0, Vp - V)))
        dec_b = jnp.pad(dec_b, ((0, Vp - V),))

    return {
        "wd_t": wd_t,
        "bd": params["dense_b"].reshape(1, H).astype(jnp.float32),
        "g": params["ln_g"].reshape(1, H).astype(jnp.float32),
        "beta": params["ln_b"].reshape(1, H).astype(jnp.float32),
        "emb_t": emb_t,
        "db": dec_b.reshape(1, Vp),
        "H": H, "V": V, "Vp": Vp, "tn": tn,
        "compute_dtype": compute_dtype,
    }


def bert_only_mlm_head(sequence_output, params, *, tm=512, tn=2048,
                       out_dtype=jnp.bfloat16, compute_dtype=jnp.bfloat16,
                       vmem_limit_bytes=48 * 1024 * 1024):
    """sequence_output: [B, S, H] -> prediction_scores: [B, S, V].

    `params` is either the raw parameter dict or (preferably) the output of
    `prepare_mlm_head_params` so weight transpose/cast/pad happens once.

    Per-generation tuning (defaults are safe everywhere):
      * v5e / v7x: tm=512, tn=2048 keeps the decoder stream compute-bound and
        fits comfortably under v7x's 64 MiB VMEM with the 48 MiB scoped limit.
      * v6e: pass tm=768..1024 (ridge ~600 FLOPs/byte) and raise
        vmem_limit_bytes to ~80-96 MiB (128 MiB physical).
    Further optional tuning: pipeline_mode=pl.Buffered(...) on the emb /
    grid-invariant specs (a few percent); left at defaults for portability.
    """
    if "emb_t" not in params:   # raw params -> prep on the fly (convenience path)
        params = prepare_mlm_head_params(params, tn=tn, compute_dtype=compute_dtype)

    B, S, H = sequence_output.shape
    V, Vp, tn = params["V"], params["Vp"], params["tn"]
    compute_dtype = params["compute_dtype"]
    M = B * S

    tm = _pick_row_tile(M, tm)
    assert tm % 8 == 0 and tn % 128 == 0
    Mp = _round_up(M, tm)

    # Flatten rows, pad M, cast MXU operand to compute dtype once.
    x = sequence_output.reshape(M, H)
    if Mp != M:
        x = jnp.pad(x, ((0, Mp - M), (0, 0)))
    x = x.astype(compute_dtype)

    out = pl.pallas_call(
        mlm_head_kernel,
        out_shape=jax.ShapeDtypeStruct((Mp, Vp), out_dtype),
        grid_spec=pltpu.PrefetchScalarGridSpec(
            num_scalar_prefetch=0,
            grid=(Mp // tm, Vp // tn),
            in_specs=[
                pl.BlockSpec((tm, H), lambda i, j: (i, 0)),   # x rows (changes with i only)
                pl.BlockSpec((H, H), lambda i, j: (0, 0)),    # dense W^T (grid-invariant)
                pl.BlockSpec((1, H), lambda i, j: (0, 0)),    # dense bias
                pl.BlockSpec((1, H), lambda i, j: (0, 0)),    # LN gamma
                pl.BlockSpec((1, H), lambda i, j: (0, 0)),    # LN beta
                pl.BlockSpec((H, tn), lambda i, j: (0, j)),   # decoder W^T tile (streams over V)
                pl.BlockSpec((1, tn), lambda i, j: (0, j)),   # decoder bias tile
            ],
            out_specs=pl.BlockSpec((tm, tn), lambda i, j: (i, j)),
            scratch_shapes=[pltpu.VMEM((tm, H), compute_dtype)],
        ),
        compiler_params=pltpu.CompilerParams(
            dimension_semantics=("parallel", "arbitrary"),
            vmem_limit_bytes=vmem_limit_bytes,
        ),
    )(x, params["wd_t"], params["bd"], params["g"], params["beta"],
      params["emb_t"], params["db"])

    # Strip padding and restore [B, S, V].
    return out[:M, :V].reshape(B, S, V)


def reference(sequence_output, params):
    """Pure-JAX f32 reference (matches the PyTorch module)."""
    x = sequence_output.astype(jnp.float32)
    h = jnp.einsum("bsh,oh->bso", x, params["dense_w"]) + params["dense_b"]
    h = h * 0.5 * (1.0 + lax.erf(h / jnp.sqrt(2.0)))
    mu = jnp.mean(h, axis=-1, keepdims=True)
    var = jnp.mean(jnp.square(h - mu), axis=-1, keepdims=True)
    h = (h - mu) / jnp.sqrt(var + 1e-12)
    h = h * params["ln_g"] + params["ln_b"]
    return jnp.einsum("bsh,vh->bsv", h, params["emb"]) + params["dec_b"]


if __name__ == "__main__":
    B, S, H, V = 2, 8, 32, 64  # batch, seq, hidden_size, vocab_size

    key = jax.random.PRNGKey(0)
    k_x, k_wd, k_bd, k_emb, k_g, k_b = jax.random.split(key, 6)

    sequence_output = jax.random.normal(k_x, (B, S, H), dtype=jnp.float32)

    params = {
        # nn.Linear(H, H): weight [out, in], bias [out]
        "dense_w": jax.random.normal(k_wd, (H, H), dtype=jnp.float32) * 0.05,
        "dense_b": jax.random.normal(k_bd, (H,), dtype=jnp.float32) * 0.01,
        # BertLayerNorm(H, eps=1e-12)
        "ln_g": 1.0 + 0.1 * jax.random.normal(k_g, (H,), dtype=jnp.float32),
        "ln_b": 0.1 * jax.random.normal(k_b, (H,), dtype=jnp.float32),
        # bert_model_embedding_weights: [V, H]; decoder bias initialized to zeros
        "emb": jax.random.normal(k_emb, (V, H), dtype=jnp.float32) * 0.05,
        "dec_b": jnp.zeros((V,), dtype=jnp.float32),
    }

    # One-time weight prep (hoisted out of the per-call hot path).
    prepared = prepare_mlm_head_params(params)

    out = bert_only_mlm_head(sequence_output, prepared)
    out = jax.block_until_ready(out)

    ref = reference(sequence_output, params)
    assert out.shape == (B, S, V)
    # bf16 MXU inputs + bf16 logits with f32 accumulation -> compare against the
    # f32 reference with bf16-appropriate tolerance.
    assert jnp.allclose(out.astype(jnp.float32), ref, atol=5e-2, rtol=5e-2), \
        "mismatch vs reference"

    print("KERNEL_OK")
</pallas_src>

<mosaic_0001>
module attributes {stable_mosaic.version = 11 : i64} {
  func.func @mlm_head_kernel(%arg0: i32, %arg1: i32, %arg2: memref<16x32xbf16, #tpu.memory_space<vmem>>, %arg3: memref<32x32xbf16, #tpu.memory_space<vmem>>, %arg4: memref<1x32xf32, #tpu.memory_space<vmem>>, %arg5: memref<1x32xf32, #tpu.memory_space<vmem>>, %arg6: memref<1x32xf32, #tpu.memory_space<vmem>>, %arg7: memref<32x128xbf16, #tpu.memory_space<vmem>>, %arg8: memref<1x128xf32, #tpu.memory_space<vmem>>, %arg9: memref<16x128xbf16, #tpu.memory_space<vmem>>, %arg10: memref<16x32xbf16, #tpu.memory_space<vmem>>) attributes {dimension_semantics = [#tpu.dimension_semantics<parallel>, #tpu.dimension_semantics<arbitrary>], iteration_bounds = array<i64: 1, 1>, scalar_prefetch = 0 : i64, scratch_operands = 1 : i64, tpu.core_type = #tpu.core_type<tc>, window_params = [{transform_indices = @transform_0, window_bounds = array<i64: 16, 32>}, {pipeline_mode = #tpu.pipeline_mode<synchronous>, transform_indices = @transform_1, window_bounds = array<i64: 32, 32>}, {pipeline_mode = #tpu.pipeline_mode<synchronous>, transform_indices = @transform_2, window_bounds = array<i64: 1, 32>}, {pipeline_mode = #tpu.pipeline_mode<synchronous>, transform_indices = @transform_3, window_bounds = array<i64: 1, 32>}, {pipeline_mode = #tpu.pipeline_mode<synchronous>, transform_indices = @transform_4, window_bounds = array<i64: 1, 32>}, {transform_indices = @transform_5, window_bounds = array<i64: 32, 128>}, {transform_indices = @transform_6, window_bounds = array<i64: 1, 128>}, {transform_indices = @transform_7, window_bounds = array<i64: 16, 128>}]} {
    %c0_i32 = arith.constant 0 : i32
    %0 = arith.cmpi eq, %arg1, %c0_i32 : i32
    %1 = arith.extui %0 : i1 to i32
    %c0_i32_0 = arith.constant 0 : i32
    %2 = arith.cmpi ne, %1, %c0_i32_0 : i32
    scf.if %2 {
      %c0_8 = arith.constant 0 : index
      %c0_9 = arith.constant 0 : index
      %11 = vector.load %arg2[%c0_8, %c0_9] : memref<16x32xbf16, #tpu.memory_space<vmem>>, vector<16x32xbf16>
      %c0_10 = arith.constant 0 : index
      %c0_11 = arith.constant 0 : index
      %12 = vector.load %arg3[%c0_10, %c0_11] : memref<32x32xbf16, #tpu.memory_space<vmem>>, vector<32x32xbf16>
      %cst_12 = arith.constant dense<0.000000e+00> : vector<16x32xf32>
      %13 = tpu.matmul %11, %12, %cst_12 {dimension_numbers = #tpu.dot_dimension_numbers<[1], [0], [0], [1], [0, 0, 1, 1], [], []>} : vector<16x32xbf16>, vector<32x32xbf16>, vector<16x32xf32> -> vector<16x32xf32>
      %c0_13 = arith.constant 0 : index
      %c0_14 = arith.constant 0 : index
      %14 = vector.load %arg4[%c0_13, %c0_14] : memref<1x32xf32, #tpu.memory_space<vmem>>, vector<1x32xf32>
      %15 = vector.broadcast %14 : vector<1x32xf32> to vector<16x32xf32>
      %16 = arith.addf %13, %15 : vector<16x32xf32>
      %cst_15 = arith.constant 5.000000e-01 : f32
      %17 = vector.broadcast %cst_15 : f32 to vector<16x32xf32>
      %18 = arith.mulf %16, %17 : vector<16x32xf32>
      %cst_16 = arith.constant 0.707106769 : f32
      %19 = vector.broadcast %cst_16 : f32 to vector<16x32xf32>
      %20 = arith.mulf %16, %19 : vector<16x32xf32>
      %21 = math.erf %20 : vector<16x32xf32>
      %cst_17 = arith.constant 1.000000e+00 : f32
      %22 = vector.broadcast %cst_17 : f32 to vector<16x32xf32>
      %23 = arith.addf %22, %21 : vector<16x32xf32>
      %24 = arith.mulf %18, %23 : vector<16x32xf32>
      %cst_18 = arith.constant dense<0.000000e+00> : vector<16xf32>
      %25 = vector.multi_reduction <add>, %24, %cst_18 [1] : vector<16x32xf32> to vector<16xf32>
      %26 = vector.shape_cast %25 : vector<16xf32> to vector<16x1xf32>
      %cst_19 = arith.constant 3.200000e+01 : f32
      %27 = vector.broadcast %cst_19 : f32 to vector<16x1xf32>
      %28 = arith.divf %26, %27 : vector<16x1xf32>
      %29 = vector.broadcast %28 : vector<16x1xf32> to vector<16x32xf32>
      %30 = arith.subf %24, %29 : vector<16x32xf32>
      %31 = arith.mulf %30, %30 : vector<16x32xf32>
      %cst_20 = arith.constant dense<0.000000e+00> : vector<16xf32>
      %32 = vector.multi_reduction <add>, %31, %cst_20 [1] : vector<16x32xf32> to vector<16xf32>
      %33 = vector.shape_cast %32 : vector<16xf32> to vector<16x1xf32>
      %cst_21 = arith.constant 3.200000e+01 : f32
      %34 = vector.broadcast %cst_21 : f32 to vector<16x1xf32>
      %35 = arith.divf %33, %34 : vector<16x1xf32>
      %36 = vector.broadcast %28 : vector<16x1xf32> to vector<16x32xf32>
      %37 = arith.subf %24, %36 : vector<16x32xf32>
      %cst_22 = arith.constant 9.99999996E-13 : f32
      %38 = vector.broadcast %cst_22 : f32 to vector<16x1xf32>
      %39 = arith.addf %35, %38 : vector<16x1xf32>
      %40 = math.rsqrt %39 : vector<16x1xf32>
      %41 = vector.broadcast %40 : vector<16x1xf32> to vector<16x32xf32>
      %42 = arith.mulf %37, %41 : vector<16x32xf32>
      %c0_23 = arith.constant 0 : index
      %c0_24 = arith.constant 0 : index
      %43 = vector.load %arg5[%c0_23, %c0_24] : memref<1x32xf32, #tpu.memory_space<vmem>>, vector<1x32xf32>
      %44 = vector.broadcast %43 : vector<1x32xf32> to vector<16x32xf32>
      %45 = arith.mulf %42, %44 : vector<16x32xf32>
      %c0_25 = arith.constant 0 : index
      %c0_26 = arith.constant 0 : index
      %46 = vector.load %arg6[%c0_25, %c0_26] : memref<1x32xf32, #tpu.memory_space<vmem>>, vector<1x32xf32>
      %47 = vector.broadcast %46 : vector<1x32xf32> to vector<16x32xf32>
      %48 = arith.addf %45, %47 : vector<16x32xf32>
      %49 = arith.truncf %48 : vector<16x32xf32> to vector<16x32xbf16>
      %c0_27 = arith.constant 0 : index
      %c0_28 = arith.constant 0 : index
      %50 = vector.load %arg10[%c0_27, %c0_28] : memref<16x32xbf16, #tpu.memory_space<vmem>>, vector<16x32xbf16>
      tpu.vector_store %arg10[%c0_27, %c0_28], %49 {strides = array<i32>} : memref<16x32xbf16, #tpu.memory_space<vmem>>, vector<16x32xbf16>,
    } else {
    }
    %c0 = arith.constant 0 : index
    %c0_1 = arith.constant 0 : index
    %3 = vector.load %arg10[%c0, %c0_1] : memref<16x32xbf16, #tpu.memory_space<vmem>>, vector<16x32xbf16>
    %c0_2 = arith.constant 0 : index
    %c0_3 = arith.constant 0 : index
    %4 = vector.load %arg7[%c0_2, %c0_3] : memref<32x128xbf16, #tpu.memory_space<vmem>>, vector<32x128xbf16>
    %cst = arith.constant dense<0.000000e+00> : vector<16x128xf32>
    %5 = tpu.matmul %3, %4, %cst {dimension_numbers = #tpu.dot_dimension_numbers<[1], [0], [0], [1], [0, 0, 1, 1], [], []>} : vector<16x32xbf16>, vector<32x128xbf16>, vector<16x128xf32> -> vector<16x128xf32>
    %c0_4 = arith.constant 0 : index
    %c0_5 = arith.constant 0 : index
    %6 = vector.load %arg8[%c0_4, %c0_5] : memref<1x128xf32, #tpu.memory_space<vmem>>, vector<1x128xf32>
    %7 = vector.broadcast %6 : vector<1x128xf32> to vector<16x128xf32>
    %8 = arith.addf %5, %7 : vector<16x128xf32>
    %9 = arith.truncf %8 : vector<16x128xf32> to vector<16x128xbf16>
    %c0_6 = arith.constant 0 : index
    %c0_7 = arith.constant 0 : index
    %10 = vector.load %arg9[%c0_6, %c0_7] : memref<16x128xbf16, #tpu.memory_space<vmem>>, vector<16x128xbf16>
    tpu.vector_store %arg9[%c0_6, %c0_7], %9 {strides = array<i32>} : memref<16x128xbf16, #tpu.memory_space<vmem>>, vector<16x128xbf16>,
    return
  }
  func.func @transform_0(%arg0: i32, %arg1: i32) -> (i32, i32) {
    %c0_i32 = arith.constant 0 : i32
    %c0_i32_0 = arith.constant 0 : i32
    return %arg0, %c0_i32 : i32, i32
  }
  func.func @transform_1(%arg0: i32, %arg1: i32) -> (i32, i32) {
    %c0_i32 = arith.constant 0 : i32
    %c0_i32_0 = arith.constant 0 : i32
    %c0_i32_1 = arith.constant 0 : i32
    return %c0_i32, %c0_i32_0 : i32, i32
  }
  func.func @transform_2(%arg0: i32, %arg1: i32) -> (i32, i32) {
    %c0_i32 = arith.constant 0 : i32
    %c0_i32_0 = arith.constant 0 : i32
    %c0_i32_1 = arith.constant 0 : i32
    return %c0_i32, %c0_i32_0 : i32, i32
  }
  func.func @transform_3(%arg0: i32, %arg1: i32) -> (i32, i32) {
    %c0_i32 = arith.constant 0 : i32
    %c0_i32_0 = arith.constant 0 : i32
    %c0_i32_1 = arith.constant 0 : i32
    return %c0_i32, %c0_i32_0 : i32, i32
  }
  func.func @transform_4(%arg0: i32, %arg1: i32) -> (i32, i32) {
    %c0_i32 = arith.constant 0 : i32
    %c0_i32_0 = arith.constant 0 : i32
    %c0_i32_1 = arith.constant 0 : i32
    return %c0_i32, %c0_i32_0 : i32, i32
  }
  func.func @transform_5(%arg0: i32, %arg1: i32) -> (i32, i32) {
    %c0_i32 = arith.constant 0 : i32
    %c0_i32_0 = arith.constant 0 : i32
    return %c0_i32, %arg1 : i32, i32
  }
  func.func @transform_6(%arg0: i32, %arg1: i32) -> (i32, i32) {
    %c0_i32 = arith.constant 0 : i32
    %c0_i32_0 = arith.constant 0 : i32
    return %c0_i32, %arg1 : i32, i32
  }
  func.func @transform_7(%arg0: i32, %arg1: i32) -> (i32, i32) {
    %c0_i32 = arith.constant 0 : i32
    return %arg0, %arg1 : i32, i32
  }
}

</mosaic_0001>

<bundles_post_ra>
// kernel: tpu_custom_call.1
= control target key start
LH: loop header
LB: loop body
LE: loop exit
PB: predicated region body
PF: predicated region fallthrough
CT: control target
= control target key end

     0   :  { %12 = vsyncpa [#allocation4], 0  ;;  %s591_s0 = inlined_call_operand.hbm [shape: bf16[16,32], index: 0, kind: input, shape index: {}]   ;;  %s592_s1 = inlined_call_operand.hbm [shape: bf16[32,32], index: 1, kind: input, shape index: {}]   ;;  %s593_s2 = inlined_call_operand.vmem [shape: f32[1,32], index: 2, kind: input, shape index: {}]   ;;  %s594_s3 = inlined_call_operand.vmem [shape: f32[1,32], index: 3, kind: input, shape index: {}]   ;;  %s595_s4 = inlined_call_operand.hbm [shape: f32[1,32], index: 4, kind: input, shape index: {}]   ;;  %s596_s5 = inlined_call_operand.vmem [shape: bf16[32,128], index: 5, kind: input, shape index: {}]   ;;  %s597_s6 = inlined_call_operand.vmem [shape: f32[1,128], index: 6, kind: input, shape index: {}]   ;;  %s598_s7 = inlined_call_operand.hbm [shape: bf16[16,128], index: 7, kind: output, shape index: {}]  }
   0x1   :  { %13 = vsyncpa [#allocation7], 0 }
   0x2   :  { %14 = vsyncpa [#allocation5], 0  ;;  %s457_s24 = smov [#allocation6]   ;;  %s458_s26 = smov [#allocation3]  }
   0x3   :  { %s32_s25 = sshll.u32 %s457_s24, 4  ;;  %s20_s27 = sshll.u32 %s458_s26, 4  ;;  %s33_s25 = int_to_ptr.vmem [resolvable:$true] %s32_s25  ;;  %s505_s27 = int_to_ptr.vmem [resolvable:$true] %s20_s27 }
   0x4   :  { %s363_s30 = scalar_lea.hbm %s592_s1, 256 }
   0x5   :  { %p364_p0 = scmp.ne.s32.totalorder %s592_s1, %s363_s30  ;;  %p367_p1 = scmp.lt.u32.totalorder %s363_s30, %s592_s1 }
   0x7   :  { %p369_p2 = pnand %p367_p1, %p364_p0 }
   0x9   :  { %372 = shalt.err (!%p369_p2)
}
   0xa   :  { %s373_s12 = scalar_lea.vmem %s33_s25, 256  ;;  %p378_p4 = scmp.lt.s32.totalorder %s33_s25, %s33_s25 }
   0xb   :  { %p374_p3 = scmp.ne.s32.totalorder %s33_s25, %s373_s12  ;;  %p379_p5 = scmp.lt.s32.totalorder %s373_s12, %s373_s12 }
   0xd   :  { %p380_p6 = por %p379_p5, %p378_p4 }
   0xf   :  { %p381_p7 = pnand %p380_p6, %p374_p3 }
  0x11   :  { %384 = shalt.err (!%p381_p7)
}
  0x12   :  { %s459_s13 = smov 64   ;;  %s460_s14 = smov 4  }
  0x13   :  { %38 = dma.hbm_to_vmem [thread:$0]  %s592_s1, 256, %s33_s25, [#allocation7], %s459_s13, %s459_s13, %s460_s14  }
  0x14   :  { %s385_s19 = scalar_lea.hbm %s591_s0, 128 }
  0x15   :  { %p386_p8 = scmp.ne.s32.totalorder %s591_s0, %s385_s19  ;;  %p389_p9 = scmp.lt.u32.totalorder %s385_s19, %s591_s0 }
  0x17   :  { %p391_p10 = pnand %p389_p9, %p386_p8 }
  0x19   :  { %394 = shalt.err (!%p391_p10)
}
  0x1a   :  { %s395_s24 = scalar_lea.vmem %s505_s27, 128  ;;  %p400_p12 = scmp.lt.s32.totalorder %s505_s27, %s505_s27 }
  0x1b   :  { %p396_p11 = scmp.ne.s32.totalorder %s505_s27, %s395_s24  ;;  %p401_p13 = scmp.lt.s32.totalorder %s395_s24, %s395_s24 }
  0x1d   :  { %p402_p0 = por %p401_p13, %p400_p12 }
  0x1f   :  { %p403_p1 = pnand %p402_p0, %p396_p11 }
  0x21   :  { %406 = shalt.err (!%p403_p1)
}
  0x22   :  { %26 = dma.hbm_to_vmem [thread:$0]  %s591_s0, 128, %s505_s27, [#allocation4], %s459_s13, %s459_s13, %s460_s14  }
  0x23   :  { %s461_s26 = smov [#allocation8]   ;;  %s407_s8 = scalar_lea.hbm %s595_s4, 16 }
  0x24   :  { %s49_s28 = sshll.u32 %s461_s26, 4  ;;  %p408_p2 = scmp.ne.s32.totalorder %s595_s4, %s407_s8  ;;  %s50_s28 = int_to_ptr.vmem [resolvable:$true] %s49_s28 }
  0x25   :  { %p411_p3 = scmp.lt.u32.totalorder %s407_s8, %s595_s4 }
  0x27   :  { %p413_p4 = pnand %p411_p3, %p408_p2 }
  0x29   :  { %416 = shalt.err (!%p413_p4)
}
  0x2a   :  { %s417_s15 = scalar_lea.vmem %s50_s28, 16  ;;  %s421_s0 = scalar_lea.vmem %s50_s28, 32 }
  0x2b   :  { %p418_p5 = scmp.ne.s32.totalorder %s50_s28, %s417_s15  ;;  %p422_p6 = scmp.lt.s32.totalorder %s50_s28, %s50_s28 }
  0x2c   :  { %p423_p7 = scmp.lt.s32.totalorder %s421_s0, %s417_s15 }
  0x2e   :  { %p424_p8 = por %p423_p7, %p422_p6 }
  0x30   :  { %p425_p9 = pnand %p424_p8, %p418_p5 }
  0x32   :  { %428 = shalt.err (!%p425_p9)
}
  0x33   :  { %52 = dma.hbm_to_vmem [thread:$0]  %s595_s4, 16, %s50_s28, [#allocation7]  }
  0x34   :  { %451 = dma.done.wait [#allocation4], 128  }
  0x35   :  { %452 = vsyncadd [#allocation4], 4294967168 }
  0x36   :  { %453 = dma.done.wait [#allocation7], 272  }
  0x37   :  { %454 = vsyncadd [#allocation7], 4294967024  ;;  %v462_v0 = vmov 0.0   ;;  %vm463_vm0 = vmmov 0   ;;  %v350_v1 = vld [vmem:[#allocation6] sm:$0xff]   ;;  %v351_v2 = vld [vmem:[#allocation6 + $0x8] sm:$0xff]  }
  0x38   :  { %326 = vmatprep.subr.bf16.mxu0 %v462_v0  ;;  %330 = vmatprep.mubr.msk.bf16.mxu0 %vm463_vm0, %v462_v0  ;;  %v352_v3 = vld [vmem:[#allocation3] sm:$0xff]   ;;  %vm101_vm1 = vcmask 261120   ;;  %v300_v4 = vld [vmem:[%s593_s2] ss:$0 sm:$0xff]  ;;  %v354_v34 = vld [vmem:[%s596_s5 + $0x8] sm:$0xff]  }
  0x39   :  { %334 = vmatprep.subr.bf16.mxu1 %v462_v0  ;;  %338 = vmatprep.mubr.msk.bf16.mxu1 %vm463_vm0, %v462_v0  ;;  %v353_v33 = vld [vmem:[%s596_s5] sm:$0xff]   ;;  %v306_v47 = vld [vmem:[#allocation8] ss:$0 sm:$0xff] }
  0x3a   :  { %327 = vmatpush3.bf16.msra.mxu0 %v350_v1  ;;  %335 = vmatpush3.bf16.msra.mxu1 %v353_v33  ;;  %v305_v43 = vld [vmem:[%s594_s3] ss:$0 sm:$0xff]  ;;  %s464_s3 = smov [#allocation9]  }
  0x3b   :  { %328 = vmatprep.subr.bf16.mxu0 %v462_v0  ;;  %336 = vmatprep.subr.bf16.mxu1 %v462_v0  ;;  %v307_v53 = vld [vmem:[%s597_s6] ss:$0 sm:$0xff]  ;;  %s287_s24 = sshll.u32 %s464_s3, 4  ;;  %s288_s24 = int_to_ptr.vmem [resolvable:$true] %s287_s24 }
  0x3c   :  { %s429_s1 = scalar_lea.vmem %s288_s24, 128  ;;  %p434_p11 = scmp.lt.s32.totalorder %s288_s24, %s288_s24 }
  0x3d   :  { %p430_p10 = scmp.ne.s32.totalorder %s288_s24, %s429_s1  ;;  %p435_p12 = scmp.lt.s32.totalorder %s429_s1, %s429_s1 }
  0x3e   :  { %329 = vmatpush3.bf16.msra.mxu0 %v351_v2  ;;  %337 = vmatpush3.bf16.msra.mxu1 %v354_v34 }
  0x3f   :  { %p436_p13 = por %p435_p12, %p434_p11 }
  0x41   :  { %331 = vmatmul.mubr.msk.bf16.vlgmr.msra.gmra.mrb[0].mxu0 %vm101_vm1, %v352_v3  ;;  %p437_p0 = pnand %p436_p13, %p430_p10 }
 0x114   :  { %v139_v5 = vpop.f32.mrb[0].mxu0 }
 0x115   :  { %v140_v6 = vadd.f32 %v300_v4, %v139_v5  ;;  %v332_v7 = vpop.f32.mrb[1].mxu0 }
 0x116   :  { %v142_v8 = vpop.f32.mrb[2].mxu0 }
 0x117   :  { %v148_v9 = vmul.f32 0.70710677, %v140_v6  ;;  %v143_v10 = vadd.f32 %v300_v4, %v142_v8  ;;  %v333_v11 = vpop.f32.mrb[3].mxu0  ;;  %v146_v14 = vmul.f32 0.5, %v140_v6 }
 0x119   :  { %355 = verf.f32 %v148_v9  ;;  %v149_v12 = vmul.f32 0.70710677, %v143_v10  ;;  %v147_v17 = vmul.f32 0.5, %v143_v10 }
 0x11b   :  { %357 = verf.f32 %v149_v12 }
 0x123   :  { %v356_v13 = vpop.eup %355 }
 0x124   :  { %v152_v15 = vadd.f32 1.0, %v356_v13 }
 0x125   :  { %v358_v16 = vpop.eup %357 }
 0x126   :  { %v154_v18 = vmul.f32 %v152_v15, %v146_v14  ;;  %v153_v19 = vadd.f32 1.0, %v358_v16 }
 0x128   :  { %v156_v20 = vsel %vm101_vm1, %v154_v18, 0.0  ;;  %v155_v21 = vmul.f32 %v153_v19, %v147_v17 }
 0x129   :  { %157 = vadd.xlane.f32.xlu0 %v156_v20 }
 0x12a   :  { %v159_v22 = vsel %vm101_vm1, %v155_v21, 0.0 }
 0x12d   :  { %160 = vadd.xlane.f32.xlu0 %v159_v22 }
 0x1b6   :  { %v158_v23 = vpop.xlane.xlu0 %157 }
 0x1b7   :  { %v163_v24 = vmul.f32 0.03125, %v158_v23 }
 0x1b9   :  { %v165_v25 = vsub.f32 %v154_v18, %v163_v24 }
 0x1ba   :  { %v161_v26 = vpop.xlane.xlu0 %160 }
 0x1bb   :  { %v164_v27 = vmul.f32 0.03125, %v161_v26  ;;  %v167_v28 = vmul.f32 %v165_v25, %v165_v25 }
 0x1bd   :  { %v166_v29 = vsub.f32 %v155_v21, %v164_v27  ;;  %v169_v30 = vsel %vm101_vm1, %v167_v28, 0.0 }
 0x1be   :  { %170 = vadd.xlane.f32.xlu1 %v169_v30 }
 0x1bf   :  { %v168_v31 = vmul.f32 %v166_v29, %v166_v29 }
 0x1c1   :  { %v172_v32 = vsel %vm101_vm1, %v168_v31, 0.0 }
 0x1c2   :  { %173 = vadd.xlane.f32.xlu1 %v172_v32 }
 0x24b   :  { %v171_v35 = vpop.xlane.xlu1 %170 }
 0x24c   :  { %v175_v36 = vmul.f32 0.03125, %v171_v35 }
 0x24e   :  { %v177_v37 = vadd.f32 1e-12, %v175_v36 }
 0x24f   :  { %v174_v38 = vpop.xlane.xlu1 %173 }
 0x250   :  { %359 = vrsqrt.f32 %v177_v37  ;;  %v176_v39 = vmul.f32 0.03125, %v174_v38 }
 0x252   :  { %v178_v40 = vadd.f32 1e-12, %v176_v39 }
 0x254   :  { %361 = vrsqrt.f32 %v178_v40 }
 0x25a   :  { %v360_v41 = vpop.eup %359 }
 0x25b   :  { %v181_v42 = vmul.f32 %v360_v41, %v165_v25 }
 0x25d   :  { %v190_v45 = vmul.f32 %v305_v43, %v181_v42 }
 0x25e   :  { %v362_v44 = vpop.eup %361 }
 0x25f   :  { %v182_v46 = vmul.f32 %v362_v44, %v166_v29  ;;  %v199_v49 = vadd.f32 %v306_v47, %v190_v45 }
 0x261   :  { %v191_v48 = vmul.f32 %v305_v43, %v182_v46 }
 0x263   :  { %v200_v50 = vadd.f32 %v306_v47, %v191_v48 }
 0x265   :  { %v201_v51 = vpack.c.bf16 %v200_v50, %v199_v49 }
 0x267   :  { %202 = vst.msk [vmem:[#allocation2] sm:$0xff] %vm101_vm1, %v201_v51 }
 0x26e   :  { %v203_v52 = vld [vmem:[#allocation2] sm:$0xff] }
 0x26f   :  { %339 = vmatmul.mubr.msk.bf16.vlgmr.msra.gmra.mrb[0].mxu1 %vm101_vm1, %v203_v52 }
 0x342   :  { %v265_v54 = vpop.f32.mrb[0].mxu1 }
 0x343   :  { %v340_v55 = vpop.f32.mrb[1].mxu1  ;;  %v266_v57 = vadd.f32 %v307_v53, %v265_v54 }
 0x344   :  { %v268_v56 = vpop.f32.mrb[2].mxu1 }
 0x345   :  { %v269_v58 = vadd.f32 %v307_v53, %v268_v56  ;;  %v341_v59 = vpop.f32.mrb[3].mxu1 }
 0x347   :  { %v318_v60 = vpack.c.bf16 %v269_v58, %v266_v57 }
 0x349   :  { %319 = vst [vmem:[#allocation9] sm:$0xff] %v318_v60  }
 0x34a   :  { %440 = shalt.err (!%p437_p0)
}
 0x34b   :  { %s441_s26 = scalar_lea.hbm %s598_s7, 128 }
 0x34c   :  { %p442_p1 = scmp.ne.s32.totalorder %s598_s7, %s441_s26  ;;  %p445_p2 = scmp.lt.u32.totalorder %s441_s26, %s598_s7 }
 0x34e   :  { %p447_p3 = pnand %p445_p2, %p442_p1 }
 0x350   :  { %450 = shalt.err (!%p447_p3)
}
 0x351   :  { %293 = dma.vmem_to_hbm [thread:$0]  %s288_s24, 128, %s598_s7, [#allocation5], %s459_s13, %s459_s13, %s460_s14  }
 0x352   :  { %455 = dma.done.wait [#allocation5], 128  }
 0x353   :  { %456 = vsyncadd [#allocation5], 4294967168 }
 0x354   :  { %297 = vsyncpa [#allocation4], 1 }
 0x355   :  { %298 = vsyncpa [#allocation7], 1 }
 0x356   :  { %299 = vsyncpa [#allocation5], 1 }

</bundles_post_ra>
